<compile_context>
chip_gen: v5e
topology: v5e:2x2
jax: 0.10.0
libtpu: 0.0.40
codegen_flags: <defaults>
</compile_context>

<pallas_src>
import math

import jax
import jax.numpy as jnp
from jax import lax
from jax.experimental import pallas as pl
from jax.experimental.pallas import tpu as pltpu

# ----------------------------------------------------------------------------
# "DefaultConfigure" equivalent (the opt object in the original code).
# Standard precipitation-nowcasting balancing config, defined in-script.
# ----------------------------------------------------------------------------
BALANCING_WEIGHTS = (1.0, 1.0, 2.0, 5.0, 10.0, 30.0)
THRESHOLDS = (0.5, 2.0, 5.0, 10.0, 30.0)
THRESHOLDS_NORM = tuple(t / 80.0 for t in THRESHOLDS)   # self._norm(ele)

NORMAL_LOSS_GLOBAL_SCALE = 5e-05
MSE_WEIGHT = 0.4
MAE_WEIGHT = 0.6
# nn.Parameter(torch.tensor(v)) with v = [0, log(0.5)] -- deterministic init.
LOG_VARS = (0.0, math.log(0.5))

TIME_WEIGHTS = {
    'default': [1.0, 1.0, 1.0, 1.0],
    '30': [1.0, 0.5, 0.3, 0.2],
    '60': [0.5, 1.0, 0.5, 0.3],
    '90': [0.3, 0.5, 1.0, 0.5],
    '120': [0.2, 0.3, 0.5, 1.0],
}

LANE = 128           # vreg lane width
SUB = 8              # vreg sublanes
CHUNK = 64           # rows per inner slab (8 vregs/array -> stays in vregs)
TR_MAX = 4096        # max rows per grid tile (2 MiB f32 / input / buffer)


def _round_up(x, m):
    return ((x + m - 1) // m) * m


# ----------------------------------------------------------------------------
# Pallas kernel factory.
# Inputs : o_ref, l_ref  (TR, 128) blocks of the (B, R, 128) view.
# Output : acc_ref       (2, 8, 128) per-batch elementwise accumulator
#          (row 0 = threshold-weighted squared error, row 1 = weighted |err|),
#          resident across the reduction axis (index map constant over k).
# ----------------------------------------------------------------------------
def _make_kernel(*, TR, R, K, needs_mask):
    n_chunks = TR // CHUNK

    def chunk_partials(o, l, mask_base):
        o = o.astype(jnp.float32)
        l = l.astype(jnp.float32)
        ad = jnp.abs(o - l)                          # |o - l|
        if mask_base is not None:
            # Zero out-of-bounds (garbage) rows of the last row-tile.
            row = mask_base + lax.broadcasted_iota(jnp.int32, (CHUNK, LANE), 0)
            ad = jnp.where(row < R, ad, 0.0)
        # weights = bw[0] + sum_i (bw[i+1]-bw[i]) * (label >= th_i)
        w = jnp.full_like(l, BALANCING_WEIGHTS[0])
        for i, th in enumerate(THRESHOLDS_NORM):
            delta = float(BALANCING_WEIGHTS[i + 1] - BALANCING_WEIGHTS[i])
            w = w + jnp.where(l >= th, delta, 0.0)
        wd = w * ad                                  # weighted abs err (SAE)
        sq = wd * ad                                 # weighted sq err  (SSE)
        # Fold the chunk into one (8, 128) slab per statistic: pure vreg adds,
        # the reshape groups whole (8, 128) tiles (no cross-tile movement).
        sq8 = jnp.sum(sq.reshape(CHUNK // SUB, SUB, LANE), axis=0)
        wd8 = jnp.sum(wd.reshape(CHUNK // SUB, SUB, LANE), axis=0)
        return sq8, wd8

    def kernel(o_ref, l_ref, acc_ref):
        k = pl.program_id(1)

        @pl.when(k == 0)
        def _():
            acc_ref[...] = jnp.zeros_like(acc_ref)

        def accumulate(masked):
            def body(c, carry):
                sq_acc, wd_acc = carry
                off = pl.multiple_of(c * CHUNK, CHUNK)
                o = o_ref[pl.ds(off, CHUNK), :]
                l = l_ref[pl.ds(off, CHUNK), :]
                mask_base = (k * TR + off) if masked else None
                sq8, wd8 = chunk_partials(o, l, mask_base)
                return sq_acc + sq8, wd_acc + wd8

            init = (jnp.zeros((SUB, LANE), jnp.float32),
                    jnp.zeros((SUB, LANE), jnp.float32))
            sq_acc, wd_acc = lax.fori_loop(0, n_chunks, body, init,
                                           unroll=min(2, n_chunks))
            acc_ref[0] += sq_acc
            acc_ref[1] += wd_acc

        if needs_mask:
            # Only the last row-tile can contain out-of-bounds rows; keep the
            # common path free of mask work.
            @pl.when(k != K - 1)
            def _():
                accumulate(masked=False)

            @pl.when(k == K - 1)
            def _():
                accumulate(masked=True)
        else:
            accumulate(masked=False)

    return kernel


def _weighted_sums(output_flat, label_flat):
    """Per-batch threshold-weighted (SSE, SAE) sums.  Returns (B, 2) f32."""
    B, N = output_flat.shape

    # Only a sub-128 lane tail needs zero padding (required for the (R, 128)
    # view); zero padding contributes exactly 0 to both sums.  Lane-aligned
    # inputs (the common case) skip this copy entirely.
    N_pad = _round_up(N, LANE)
    if N_pad != N:
        pad = N_pad - N
        output_flat = jnp.pad(output_flat, ((0, 0), (0, pad)))
        label_flat = jnp.pad(label_flat, ((0, 0), (0, pad)))

    R = N_pad // LANE                              # valid rows of 128 lanes
    K0 = pl.cdiv(R, TR_MAX)
    TR = _round_up(pl.cdiv(R, K0), CHUNK)          # balanced tile, <= TR_MAX
    K = pl.cdiv(R, TR)                             # last tile masked in-kernel
    needs_mask = (R % TR) != 0

    o3 = output_flat.reshape(B, R, LANE)
    l3 = label_flat.reshape(B, R, LANE)

    kernel = _make_kernel(TR=TR, R=R, K=K, needs_mask=needs_mask)

    in_bytes = (jnp.dtype(output_flat.dtype).itemsize
                + jnp.dtype(label_flat.dtype).itemsize)
    cost = pl.CostEstimate(
        flops=20 * B * R * LANE,
        transcendentals=0,
        bytes_accessed=B * R * LANE * in_bytes + B * 2 * SUB * LANE * 4,
    )

    acc = pl.pallas_call(
        kernel,
        out_shape=jax.ShapeDtypeStruct((B, 2, SUB, LANE), jnp.float32),
        grid=(B, K),
        in_specs=[
            pl.BlockSpec((pl.Squeezed(), TR, LANE), lambda b, k: (b, k, 0)),
            pl.BlockSpec((pl.Squeezed(), TR, LANE), lambda b, k: (b, k, 0)),
        ],
        out_specs=pl.BlockSpec((pl.Squeezed(), 2, SUB, LANE),
                               lambda b, k: (b, 0, 0, 0)),
        compiler_params=pltpu.CompilerParams(
            dimension_semantics=("parallel", "arbitrary"),
            vmem_limit_bytes=32 * 1024 * 1024,
        ),
        cost_estimate=cost,
    )(o3, l3)                                       # (B, 2, 8, 128)

    return jnp.sum(acc, axis=(2, 3))                # (B, 2): tiny final reduce


# ----------------------------------------------------------------------------
# Full forward pass (matches MyLoss.forward semantics, incl. its broadcasting).
# ----------------------------------------------------------------------------
def my_loss(output_reg, label_reg, focus_time='default'):
    B = output_reg.shape[0]

    # Keep HBM dtype (e.g. bf16) for the kernel; upcast happens in-kernel.
    o2 = output_reg.reshape(B, -1)
    l2 = label_reg.reshape(B, -1)

    sums = _weighted_sums(o2, l2)            # (B, 2)
    loss_reg_1 = sums[:, 0]                  # weighted MSE sum over (1,2,3)
    loss_reg_2 = sums[:, 1]                  # weighted MAE sum over (1,2,3)

    loss_reg = NORMAL_LOSS_GLOBAL_SCALE * (
        MSE_WEIGHT * loss_reg_1 + MAE_WEIGHT * loss_reg_2
    )                                        # (B,)

    # Reproduce the PyTorch broadcast exactly: (B,) * (1, 4, 1, 1) -> (1, 4, 1, B)
    weights = jnp.asarray(TIME_WEIGHTS[focus_time], dtype=jnp.float32).reshape(1, -1, 1, 1)
    loss_reg = loss_reg * weights            # (1, 4, 1, B)
    loss_reg = jnp.expand_dims(jnp.sum(loss_reg, axis=1), 1)   # (1, 1, 1, B)

    log_vars = jnp.asarray(LOG_VARS, dtype=jnp.float32)
    precision2 = jnp.exp(-log_vars[1])
    loss = jnp.sum(0.5 * precision2 * loss_reg + jnp.abs(log_vars[1]), axis=-1)
    loss = jnp.mean(loss)
    return loss


# ----------------------------------------------------------------------------
# Pure-JAX reference (mirrors the PyTorch code 1:1) for a correctness check.
# ----------------------------------------------------------------------------
def _reference_loss(output_reg, label_reg, focus_time='default'):
    output_reg = output_reg.astype(jnp.float32)
    label_reg = label_reg.astype(jnp.float32)
    w = jnp.full_like(output_reg, BALANCING_WEIGHTS[0])
    for i, th in enumerate(THRESHOLDS_NORM):
        w = w + (BALANCING_WEIGHTS[i + 1] - BALANCING_WEIGHTS[i]) * (
            label_reg >= th
        ).astype(jnp.float32)
    l1 = jnp.sum((output_reg - label_reg) ** 2 * w, axis=(1, 2, 3))
    l2 = jnp.sum(jnp.abs(output_reg - label_reg) * w, axis=(1, 2, 3))
    loss_reg = NORMAL_LOSS_GLOBAL_SCALE * (MSE_WEIGHT * l1 + MAE_WEIGHT * l2)
    weights = jnp.asarray(TIME_WEIGHTS[focus_time], dtype=jnp.float32).reshape(1, -1, 1, 1)
    loss_reg = loss_reg * weights
    loss_reg = jnp.expand_dims(jnp.sum(loss_reg, axis=1), 1)
    log_vars = jnp.asarray(LOG_VARS, dtype=jnp.float32)
    precision2 = jnp.exp(-log_vars[1])
    loss = jnp.sum(0.5 * precision2 * loss_reg + jnp.abs(log_vars[1]), axis=-1)
    return jnp.mean(loss)


def _check(out, lab, focus):
    got = jax.block_until_ready(my_loss(out, lab, focus_time=focus))
    ref = jax.block_until_ready(_reference_loss(out, lab, focus))
    assert jnp.allclose(got, ref, rtol=1e-4, atol=1e-6), (got, ref)


if __name__ == "__main__":
    key = jax.random.PRNGKey(0)

    # Case 1: lane-aligned small shape (B, C, H, W) = (2, 4, 16, 16).
    k1, k2 = jax.random.split(key)
    B, C, H, W = 2, 4, 16, 16
    # Labels in [0, 1) straddle the normalized thresholds
    # ([0.00625, 0.025, 0.0625, 0.125, 0.375]); predictions nearby.
    label_reg = jax.random.uniform(k1, (B, C, H, W), dtype=jnp.float32)
    output_reg = label_reg + 0.05 * jax.random.normal(k2, (B, C, H, W), dtype=jnp.float32)
    _check(output_reg, label_reg, 'default')

    # Case 2: non-128-aligned shape exercises the small lane-tail pad path.
    k3, k4 = jax.random.split(k2)
    label2 = jax.random.uniform(k3, (2, 3, 17, 19), dtype=jnp.float32)
    output2 = label2 + 0.05 * jax.random.normal(k4, (2, 3, 17, 19), dtype=jnp.float32)
    _check(output2, label2, '60')

    # Case 3: larger shape -> multiple row-tiles (K > 1) with a masked tail
    # and multi-chunk inner loop.
    k5, k6 = jax.random.split(k4)
    label3 = jax.random.uniform(k5, (1, 16, 208, 160), dtype=jnp.float32)
    output3 = label3 + 0.05 * jax.random.normal(k6, (1, 16, 208, 160), dtype=jnp.float32)
    _check(output3, label3, '90')

    # Case 4: bf16 inputs (kernel upcasts in-VMEM); reference sees the same
    # bf16-rounded values, so threshold bucketing matches exactly.
    label4 = label_reg.astype(jnp.bfloat16)
    output4 = output_reg.astype(jnp.bfloat16)
    _check(output4, label4, '30')

    print("KERNEL_OK")
</pallas_src>

<mosaic_0001>
module attributes {stable_mosaic.version = 11 : i64} {
  func.func @kernel(%arg0: i32, %arg1: i32, %arg2: memref<1x64x128xf32, #tpu.memory_space<vmem>>, %arg3: memref<1x64x128xf32, #tpu.memory_space<vmem>>, %arg4: memref<1x2x8x128xf32, #tpu.memory_space<vmem>>) attributes {dimension_semantics = [#tpu.dimension_semantics<parallel>, #tpu.dimension_semantics<arbitrary>], iteration_bounds = array<i64: 2, 1>, scalar_prefetch = 0 : i64, scratch_operands = 0 : i64, tpu.core_type = #tpu.core_type<tc>, window_params = [{transform_indices = @transform_0, window_bounds = array<i64: 1, 64, 128>}, {transform_indices = @transform_1, window_bounds = array<i64: 1, 64, 128>}, {transform_indices = @transform_2, window_bounds = array<i64: 1, 2, 8, 128>}]} {
    %c0_i32 = arith.constant 0 : i32
    %0 = arith.cmpi eq, %arg1, %c0_i32 : i32
    %1 = arith.extui %0 : i1 to i32
    %c0_i32_0 = arith.constant 0 : i32
    %2 = arith.cmpi ne, %1, %c0_i32_0 : i32
    scf.if %2 {
      %cst = arith.constant 0.000000e+00 : f32
      %9 = vector.broadcast %cst : f32 to vector<2x8x128xf32>
      %c0 = arith.constant 0 : index
      %c0_5 = arith.constant 0 : index
      %c0_6 = arith.constant 0 : index
      %c0_7 = arith.constant 0 : index
      %10 = vector.load %arg4[%c0, %c0_5, %c0_6, %c0_7] : memref<1x2x8x128xf32, #tpu.memory_space<vmem>>, vector<1x2x8x128xf32>
      %11 = vector.shape_cast %10 : vector<1x2x8x128xf32> to vector<2x8x128xf32>
      %12 = vector.shape_cast %9 : vector<2x8x128xf32> to vector<1x2x8x128xf32>
      tpu.vector_store %arg4[%c0, %c0_5, %c0_6, %c0_7], %12 {strides = array<i32>} : memref<1x2x8x128xf32, #tpu.memory_space<vmem>>, vector<1x2x8x128xf32>,
    } else {
    }
    %c0_i32_1 = arith.constant 0 : i32
    %3 = arith.cmpi ne, %arg1, %c0_i32_1 : i32
    %4 = arith.extui %3 : i1 to i32
    %c0_i32_2 = arith.constant 0 : i32
    %5 = arith.cmpi ne, %4, %c0_i32_2 : i32
    scf.if %5 {
      %cst = arith.constant 0.000000e+00 : f32
      %9 = vector.broadcast %cst : f32 to vector<8x128xf32>
      %cst_5 = arith.constant 0.000000e+00 : f32
      %10 = vector.broadcast %cst_5 : f32 to vector<8x128xf32>
      %c0_i32_6 = arith.constant 0 : i32
      %c64_i32 = arith.constant 64 : i32
      %11 = arith.muli %c0_i32_6, %c64_i32 : i32
      %12 = tpu.assume_multiple %11, 64 : i32
      %c0 = arith.constant 0 : index
      %13 = arith.index_cast %12 : i32 to index
      %c0_7 = arith.constant 0 : index
      %14 = vector.load %arg2[%c0, %13, %c0_7] : memref<1x64x128xf32, #tpu.memory_space<vmem>>, vector<1x64x128xf32>
      %15 = vector.shape_cast %14 : vector<1x64x128xf32> to vector<64x128xf32>
      %c0_8 = arith.constant 0 : index
      %16 = arith.index_cast %12 : i32 to index
      %c0_9 = arith.constant 0 : index
      %17 = vector.load %arg3[%c0_8, %16, %c0_9] : memref<1x64x128xf32, #tpu.memory_space<vmem>>, vector<1x64x128xf32>
      %18 = vector.shape_cast %17 : vector<1x64x128xf32> to vector<64x128xf32>
      %19 = arith.subf %15, %18 : vector<64x128xf32>
      %20 = math.absf %19 : vector<64x128xf32>
      %cst_10 = arith.constant 1.000000e+00 : f32
      %21 = vector.broadcast %cst_10 : f32 to vector<64x128xf32>
      %cst_11 = arith.constant 6.250000e-03 : f32
      %22 = vector.broadcast %cst_11 : f32 to vector<64x128xf32>
      %23 = arith.cmpf oge, %18, %22 : vector<64x128xf32>
      %cst_12 = arith.constant 0.000000e+00 : f32
      %cst_13 = arith.constant 0.000000e+00 : f32
      %24 = vector.broadcast %cst_12 : f32 to vector<64x128xf32>
      %25 = vector.broadcast %cst_13 : f32 to vector<64x128xf32>
      %26 = arith.select %23, %24, %25 : vector<64x128xi1>, vector<64x128xf32>
      %27 = arith.addf %21, %26 : vector<64x128xf32>
      %cst_14 = arith.constant 2.500000e-02 : f32
      %28 = vector.broadcast %cst_14 : f32 to vector<64x128xf32>
      %29 = arith.cmpf oge, %18, %28 : vector<64x128xf32>
      %cst_15 = arith.constant 1.000000e+00 : f32
      %cst_16 = arith.constant 0.000000e+00 : f32
      %30 = vector.broadcast %cst_15 : f32 to vector<64x128xf32>
      %31 = vector.broadcast %cst_16 : f32 to vector<64x128xf32>
      %32 = arith.select %29, %30, %31 : vector<64x128xi1>, vector<64x128xf32>
      %33 = arith.addf %27, %32 : vector<64x128xf32>
      %cst_17 = arith.constant 6.250000e-02 : f32
      %34 = vector.broadcast %cst_17 : f32 to vector<64x128xf32>
      %35 = arith.cmpf oge, %18, %34 : vector<64x128xf32>
      %cst_18 = arith.constant 3.000000e+00 : f32
      %cst_19 = arith.constant 0.000000e+00 : f32
      %36 = vector.broadcast %cst_18 : f32 to vector<64x128xf32>
      %37 = vector.broadcast %cst_19 : f32 to vector<64x128xf32>
      %38 = arith.select %35, %36, %37 : vector<64x128xi1>, vector<64x128xf32>
      %39 = arith.addf %33, %38 : vector<64x128xf32>
      %cst_20 = arith.constant 1.250000e-01 : f32
      %40 = vector.broadcast %cst_20 : f32 to vector<64x128xf32>
      %41 = arith.cmpf oge, %18, %40 : vector<64x128xf32>
      %cst_21 = arith.constant 5.000000e+00 : f32
      %cst_22 = arith.constant 0.000000e+00 : f32
      %42 = vector.broadcast %cst_21 : f32 to vector<64x128xf32>
      %43 = vector.broadcast %cst_22 : f32 to vector<64x128xf32>
      %44 = arith.select %41, %42, %43 : vector<64x128xi1>, vector<64x128xf32>
      %45 = arith.addf %39, %44 : vector<64x128xf32>
      %cst_23 = arith.constant 3.750000e-01 : f32
      %46 = vector.broadcast %cst_23 : f32 to vector<64x128xf32>
      %47 = arith.cmpf oge, %18, %46 : vector<64x128xf32>
      %cst_24 = arith.constant 2.000000e+01 : f32
      %cst_25 = arith.constant 0.000000e+00 : f32
      %48 = vector.broadcast %cst_24 : f32 to vector<64x128xf32>
      %49 = vector.broadcast %cst_25 : f32 to vector<64x128xf32>
      %50 = arith.select %47, %48, %49 : vector<64x128xi1>, vector<64x128xf32>
      %51 = arith.addf %45, %50 : vector<64x128xf32>
      %52 = arith.mulf %51, %20 : vector<64x128xf32>
      %53 = arith.mulf %52, %20 : vector<64x128xf32>
      %54 = vector.shape_cast %53 : vector<64x128xf32> to vector<8x8x128xf32>
      %cst_26 = arith.constant dense<0.000000e+00> : vector<8x128xf32>
      %55 = vector.multi_reduction <add>, %54, %cst_26 [0] : vector<8x8x128xf32> to vector<8x128xf32>
      %56 = vector.shape_cast %52 : vector<64x128xf32> to vector<8x8x128xf32>
      %cst_27 = arith.constant dense<0.000000e+00> : vector<8x128xf32>
      %57 = vector.multi_reduction <add>, %56, %cst_27 [0] : vector<8x8x128xf32> to vector<8x128xf32>
      %58 = arith.addf %9, %55 : vector<8x128xf32>
      %59 = arith.addf %10, %57 : vector<8x128xf32>
      %c1_i32 = arith.constant 1 : i32
      %c0_28 = arith.constant 0 : index
      %c0_29 = arith.constant 0 : index
      %c0_30 = arith.constant 0 : index
      %c0_31 = arith.constant 0 : index
      %60 = vector.load %arg4[%c0_28, %c0_29, %c0_30, %c0_31] : memref<1x2x8x128xf32, #tpu.memory_space<vmem>>, vector<1x1x8x128xf32>
      %61 = vector.shape_cast %60 : vector<1x1x8x128xf32> to vector<8x128xf32>
      %62 = arith.addf %61, %58 : vector<8x128xf32>
      %c0_32 = arith.constant 0 : index
      %c0_33 = arith.constant 0 : index
      %c0_34 = arith.constant 0 : index
      %c0_35 = arith.constant 0 : index
      %63 = vector.load %arg4[%c0_32, %c0_33, %c0_34, %c0_35] : memref<1x2x8x128xf32, #tpu.memory_space<vmem>>, vector<1x1x8x128xf32>
      %64 = vector.shape_cast %63 : vector<1x1x8x128xf32> to vector<8x128xf32>
      %65 = vector.shape_cast %62 : vector<8x128xf32> to vector<1x1x8x128xf32>
      tpu.vector_store %arg4[%c0_32, %c0_33, %c0_34, %c0_35], %65 {strides = array<i32>} : memref<1x2x8x128xf32, #tpu.memory_space<vmem>>, vector<1x1x8x128xf32>,
      %c0_36 = arith.constant 0 : index
      %c1 = arith.constant 1 : index
      %c0_37 = arith.constant 0 : index
      %c0_38 = arith.constant 0 : index
      %66 = vector.load %arg4[%c0_36, %c1, %c0_37, %c0_38] : memref<1x2x8x128xf32, #tpu.memory_space<vmem>>, vector<1x1x8x128xf32>
      %67 = vector.shape_cast %66 : vector<1x1x8x128xf32> to vector<8x128xf32>
      %68 = arith.addf %67, %59 : vector<8x128xf32>
      %c0_39 = arith.constant 0 : index
      %c1_40 = arith.constant 1 : index
      %c0_41 = arith.constant 0 : index
      %c0_42 = arith.constant 0 : index
      %69 = vector.load %arg4[%c0_39, %c1_40, %c0_41, %c0_42] : memref<1x2x8x128xf32, #tpu.memory_space<vmem>>, vector<1x1x8x128xf32>
      %70 = vector.shape_cast %69 : vector<1x1x8x128xf32> to vector<8x128xf32>
      %71 = vector.shape_cast %68 : vector<8x128xf32> to vector<1x1x8x128xf32>
      tpu.vector_store %arg4[%c0_39, %c1_40, %c0_41, %c0_42], %71 {strides = array<i32>} : memref<1x2x8x128xf32, #tpu.memory_space<vmem>>, vector<1x1x8x128xf32>,
    } else {
    }
    %c0_i32_3 = arith.constant 0 : i32
    %6 = arith.cmpi eq, %arg1, %c0_i32_3 : i32
    %7 = arith.extui %6 : i1 to i32
    %c0_i32_4 = arith.constant 0 : i32
    %8 = arith.cmpi ne, %7, %c0_i32_4 : i32
    scf.if %8 {
      %cst = arith.constant 0.000000e+00 : f32
      %9 = vector.broadcast %cst : f32 to vector<8x128xf32>
      %cst_5 = arith.constant 0.000000e+00 : f32
      %10 = vector.broadcast %cst_5 : f32 to vector<8x128xf32>
      %c0_i32_6 = arith.constant 0 : i32
      %c64_i32 = arith.constant 64 : i32
      %11 = arith.muli %c0_i32_6, %c64_i32 : i32
      %12 = tpu.assume_multiple %11, 64 : i32
      %c0 = arith.constant 0 : index
      %13 = arith.index_cast %12 : i32 to index
      %c0_7 = arith.constant 0 : index
      %14 = vector.load %arg2[%c0, %13, %c0_7] : memref<1x64x128xf32, #tpu.memory_space<vmem>>, vector<1x64x128xf32>
      %15 = vector.shape_cast %14 : vector<1x64x128xf32> to vector<64x128xf32>
      %c0_8 = arith.constant 0 : index
      %16 = arith.index_cast %12 : i32 to index
      %c0_9 = arith.constant 0 : index
      %17 = vector.load %arg3[%c0_8, %16, %c0_9] : memref<1x64x128xf32, #tpu.memory_space<vmem>>, vector<1x64x128xf32>
      %18 = vector.shape_cast %17 : vector<1x64x128xf32> to vector<64x128xf32>
      %c64_i32_10 = arith.constant 64 : i32
      %19 = arith.muli %arg1, %c64_i32_10 : i32
      %20 = arith.addi %19, %12 : i32
      %21 = arith.subf %15, %18 : vector<64x128xf32>
      %22 = math.absf %21 : vector<64x128xf32>
      %23 = tpu.iota {dimensions = array<i32: 0>} : vector<64x128xi32>
      %24 = vector.broadcast %20 : i32 to vector<64x128xi32>
      %25 = arith.addi %24, %23 : vector<64x128xi32>
      %c8_i32 = arith.constant 8 : i32
      %26 = vector.broadcast %c8_i32 : i32 to vector<64x128xi32>
      %27 = arith.cmpi slt, %25, %26 : vector<64x128xi32>
      %cst_11 = arith.constant 0.000000e+00 : f32
      %28 = vector.broadcast %cst_11 : f32 to vector<64x128xf32>
      %29 = arith.select %27, %22, %28 : vector<64x128xi1>, vector<64x128xf32>
      %cst_12 = arith.constant 1.000000e+00 : f32
      %30 = vector.broadcast %cst_12 : f32 to vector<64x128xf32>
      %cst_13 = arith.constant 6.250000e-03 : f32
      %31 = vector.broadcast %cst_13 : f32 to vector<64x128xf32>
      %32 = arith.cmpf oge, %18, %31 : vector<64x128xf32>
      %cst_14 = arith.constant 0.000000e+00 : f32
      %cst_15 = arith.constant 0.000000e+00 : f32
      %33 = vector.broadcast %cst_14 : f32 to vector<64x128xf32>
      %34 = vector.broadcast %cst_15 : f32 to vector<64x128xf32>
      %35 = arith.select %32, %33, %34 : vector<64x128xi1>, vector<64x128xf32>
      %36 = arith.addf %30, %35 : vector<64x128xf32>
      %cst_16 = arith.constant 2.500000e-02 : f32
      %37 = vector.broadcast %cst_16 : f32 to vector<64x128xf32>
      %38 = arith.cmpf oge, %18, %37 : vector<64x128xf32>
      %cst_17 = arith.constant 1.000000e+00 : f32
      %cst_18 = arith.constant 0.000000e+00 : f32
      %39 = vector.broadcast %cst_17 : f32 to vector<64x128xf32>
      %40 = vector.broadcast %cst_18 : f32 to vector<64x128xf32>
      %41 = arith.select %38, %39, %40 : vector<64x128xi1>, vector<64x128xf32>
      %42 = arith.addf %36, %41 : vector<64x128xf32>
      %cst_19 = arith.constant 6.250000e-02 : f32
      %43 = vector.broadcast %cst_19 : f32 to vector<64x128xf32>
      %44 = arith.cmpf oge, %18, %43 : vector<64x128xf32>
      %cst_20 = arith.constant 3.000000e+00 : f32
      %cst_21 = arith.constant 0.000000e+00 : f32
      %45 = vector.broadcast %cst_20 : f32 to vector<64x128xf32>
      %46 = vector.broadcast %cst_21 : f32 to vector<64x128xf32>
      %47 = arith.select %44, %45, %46 : vector<64x128xi1>, vector<64x128xf32>
      %48 = arith.addf %42, %47 : vector<64x128xf32>
      %cst_22 = arith.constant 1.250000e-01 : f32
      %49 = vector.broadcast %cst_22 : f32 to vector<64x128xf32>
      %50 = arith.cmpf oge, %18, %49 : vector<64x128xf32>
      %cst_23 = arith.constant 5.000000e+00 : f32
      %cst_24 = arith.constant 0.000000e+00 : f32
      %51 = vector.broadcast %cst_23 : f32 to vector<64x128xf32>
      %52 = vector.broadcast %cst_24 : f32 to vector<64x128xf32>
      %53 = arith.select %50, %51, %52 : vector<64x128xi1>, vector<64x128xf32>
      %54 = arith.addf %48, %53 : vector<64x128xf32>
      %cst_25 = arith.constant 3.750000e-01 : f32
      %55 = vector.broadcast %cst_25 : f32 to vector<64x128xf32>
      %56 = arith.cmpf oge, %18, %55 : vector<64x128xf32>
      %cst_26 = arith.constant 2.000000e+01 : f32
      %cst_27 = arith.constant 0.000000e+00 : f32
      %57 = vector.broadcast %cst_26 : f32 to vector<64x128xf32>
      %58 = vector.broadcast %cst_27 : f32 to vector<64x128xf32>
      %59 = arith.select %56, %57, %58 : vector<64x128xi1>, vector<64x128xf32>
      %60 = arith.addf %54, %59 : vector<64x128xf32>
      %61 = arith.mulf %60, %29 : vector<64x128xf32>
      %62 = arith.mulf %61, %29 : vector<64x128xf32>
      %63 = vector.shape_cast %62 : vector<64x128xf32> to vector<8x8x128xf32>
      %cst_28 = arith.constant dense<0.000000e+00> : vector<8x128xf32>
      %64 = vector.multi_reduction <add>, %63, %cst_28 [0] : vector<8x8x128xf32> to vector<8x128xf32>
      %65 = vector.shape_cast %61 : vector<64x128xf32> to vector<8x8x128xf32>
      %cst_29 = arith.constant dense<0.000000e+00> : vector<8x128xf32>
      %66 = vector.multi_reduction <add>, %65, %cst_29 [0] : vector<8x8x128xf32> to vector<8x128xf32>
      %67 = arith.addf %9, %64 : vector<8x128xf32>
      %68 = arith.addf %10, %66 : vector<8x128xf32>
      %c1_i32 = arith.constant 1 : i32
      %c0_30 = arith.constant 0 : index
      %c0_31 = arith.constant 0 : index
      %c0_32 = arith.constant 0 : index
      %c0_33 = arith.constant 0 : index
      %69 = vector.load %arg4[%c0_30, %c0_31, %c0_32, %c0_33] : memref<1x2x8x128xf32, #tpu.memory_space<vmem>>, vector<1x1x8x128xf32>
      %70 = vector.shape_cast %69 : vector<1x1x8x128xf32> to vector<8x128xf32>
      %71 = arith.addf %70, %67 : vector<8x128xf32>
      %c0_34 = arith.constant 0 : index
      %c0_35 = arith.constant 0 : index
      %c0_36 = arith.constant 0 : index
      %c0_37 = arith.constant 0 : index
      %72 = vector.load %arg4[%c0_34, %c0_35, %c0_36, %c0_37] : memref<1x2x8x128xf32, #tpu.memory_space<vmem>>, vector<1x1x8x128xf32>
      %73 = vector.shape_cast %72 : vector<1x1x8x128xf32> to vector<8x128xf32>
      %74 = vector.shape_cast %71 : vector<8x128xf32> to vector<1x1x8x128xf32>
      tpu.vector_store %arg4[%c0_34, %c0_35, %c0_36, %c0_37], %74 {strides = array<i32>} : memref<1x2x8x128xf32, #tpu.memory_space<vmem>>, vector<1x1x8x128xf32>,
      %c0_38 = arith.constant 0 : index
      %c1 = arith.constant 1 : index
      %c0_39 = arith.constant 0 : index
      %c0_40 = arith.constant 0 : index
      %75 = vector.load %arg4[%c0_38, %c1, %c0_39, %c0_40] : memref<1x2x8x128xf32, #tpu.memory_space<vmem>>, vector<1x1x8x128xf32>
      %76 = vector.shape_cast %75 : vector<1x1x8x128xf32> to vector<8x128xf32>
      %77 = arith.addf %76, %68 : vector<8x128xf32>
      %c0_41 = arith.constant 0 : index
      %c1_42 = arith.constant 1 : index
      %c0_43 = arith.constant 0 : index
      %c0_44 = arith.constant 0 : index
      %78 = vector.load %arg4[%c0_41, %c1_42, %c0_43, %c0_44] : memref<1x2x8x128xf32, #tpu.memory_space<vmem>>, vector<1x1x8x128xf32>
      %79 = vector.shape_cast %78 : vector<1x1x8x128xf32> to vector<8x128xf32>
      %80 = vector.shape_cast %77 : vector<8x128xf32> to vector<1x1x8x128xf32>
      tpu.vector_store %arg4[%c0_41, %c1_42, %c0_43, %c0_44], %80 {strides = array<i32>} : memref<1x2x8x128xf32, #tpu.memory_space<vmem>>, vector<1x1x8x128xf32>,
    } else {
    }
    return
  }
  func.func @transform_0(%arg0: i32, %arg1: i32) -> (i32, i32, i32) {
    %c0_i32 = arith.constant 0 : i32
    %c0_i32_0 = arith.constant 0 : i32
    return %arg0, %arg1, %c0_i32 : i32, i32, i32
  }
  func.func @transform_1(%arg0: i32, %arg1: i32) -> (i32, i32, i32) {
    %c0_i32 = arith.constant 0 : i32
    %c0_i32_0 = arith.constant 0 : i32
    return %arg0, %arg1, %c0_i32 : i32, i32, i32
  }
  func.func @transform_2(%arg0: i32, %arg1: i32) -> (i32, i32, i32, i32) {
    %c0_i32 = arith.constant 0 : i32
    %c0_i32_0 = arith.constant 0 : i32
    %c0_i32_1 = arith.constant 0 : i32
    %c0_i32_2 = arith.constant 0 : i32
    return %arg0, %c0_i32, %c0_i32_0, %c0_i32_1 : i32, i32, i32, i32
  }
}

</mosaic_0001>

<bundles_post_ra>
// kernel: tpu_custom_call.1
= control target key start
LH: loop header
LB: loop body
LE: loop exit
PB: predicated region body
PF: predicated region fallthrough
CT: control target
= control target key end

     0   :  { %7 = vsyncpa [#allocation3], 0  ;;  %s1212_s0 = inlined_call_operand.hbm [shape: f32[2,8,128], index: 0, kind: input, shape index: {}]   ;;  %s1213_s1 = inlined_call_operand.hbm [shape: f32[2,8,128], index: 1, kind: input, shape index: {}]   ;;  %s1214_s2 = inlined_call_operand.hbm [shape: f32[2,2,8,128], index: 2, kind: output, shape index: {}]  }
   0x1   :  { %9 = vsyncpa [#allocation3 + $0x1], 0 }
   0x2   :  { %10 = vsyncpa [#allocation6], 0 }
   0x3   :  { %12 = vsyncpa [#allocation6 + $0x1], 0 }
   0x4   :  { %13 = vsyncpa [#allocation4], 0 }
   0x5   :  { %15 = vsyncpa [#allocation4 + $0x1], 0  ;;  %s991_s9 = smov 0   ;;  %s993_s10 = smov 0  }
   0x6   :  { %s995_s11 = smov 0   ;;  %s997_s12 = smov 0  }
   0x7   :  { %s999_s13 = smov 0   ;;  %s1001_s14 = smov 0  }
   0x8 LB: > { %s747_s15 = sadd.s32 4294967295, %s967_s14   ;;  %s748_s16 = sadd.s32 4294967294, %s967_s14   ;;  %s967_s14 = sphi %s1001_s14, %s21_s14   ;;  %s963_s13 = sphi %s999_s13, %s1223_s13   ;;  %s959_s12 = sphi %s997_s12, %s1222_s12   ;;  %s955_s11 = sphi %s995_s11, %s1221_s11   ;;  %s951_s10 = sphi %s993_s10, %s1220_s10   ;;  %s947_s9 = sphi %s991_s9, %s1219_s9  }
   0x9   : > { %s33_s17 = sadd.s32 1, %s963_s13  ;;  %s42_s18 = sadd.s32 1, %s955_s11 }
   0xa   : > { %p35_p0 = scmp.ge.s32.totalorder %s33_s17, 2  ;;  %p49_p1 = scmp.ne.s32.totalorder %s955_s11, %s951_s10 }
   0xb   : > { %p50_p2 = scmp.eq.s32.totalorder %s967_s14, 0  ;;  %p55_p3 = scmp.ne.s32.totalorder %s951_s10, %s947_s9 }
   0xc   : > { %s1225_s17 = smov (%p35_p0, %s33_s17), 0  ;;  %p56_p5 = scmp.eq.s32.totalorder %s747_s15, 0 }
   0xd   : > { %p1032_p4 = por %p50_p2, %p49_p1  ;;  %s37_s20 = ssub.s32 %s963_s13, %s1225_s17 }
   0xe   : > { %p107_p6 = scmp.eq.s32.totalorder %s747_s15, 1  ;;  %p40_p7 = scmp.eq.s32.totalorder %s37_s20, 0 }
   0xf   : > { %p1038_p8 = por %p56_p5, %p55_p3  ;;  %p113_p10 = scmp.eq.s32.totalorder %s748_s16, 1 }
  0x10   : > { %p1042_p9 = por %p107_p6, %p49_p1  ;;  %p750_p12 = scmp.ge.s32.totalorder %s967_s14, 2 }
  0x11   : > { %s1047_s23 = scalar_select %p40_p7, %s955_s11, %s42_s18  }
  0x12   : > { %p1049_p11 = por %p113_p10, %p55_p3  ;;  %129 = sbr.rel (%p750_p12) target bundleno = 41 (0x29), region = 16 }
  0x17   : > { %132 = sbr.rel (!%p1032_p4) target bundleno = 32 (0x20), region = 20  ;;  %s133_s25 = sand.u32 (%p1032_p4), 1, %s955_s11  }
  0x18   : > { %s751_s26 = sshll.u32 (%p1032_p4), %s133_s25, 6  ;;  %s134_s27 = scalar_lea.sflag (%p1032_p4), [#allocation3], %s133_s25 }
  0x19   : > { %s137_s28 = scalar_lea.vmem (%p1032_p4), [#allocation2], %s751_s26 }
  0x1c   : > { %143 = vsyncadd %s134_s27, 896  ;;  %s752_s29 = sshll.u32 %s963_s13, 3  ;;  %s151_s30 = sshll.u32 %s137_s28, 4  ;;  %s152_s30 = int_to_ptr.vmem [resolvable:$true] %s151_s30 }
  0x1d   : > { %s147_s5 = scalar_lea.hbm %s1212_s0, %s752_s29  ;;  %s969_s7 = smov 128  }
  0x1e   : > { %s149_s6 = sshll.u32 %s147_s5, 4  ;;  %s970_s8 = smov 8   ;;  %s150_s6 = int_to_ptr.hbm [resolvable:$true] %s149_s6 }
  0x1f   : > { %157 = dma.hbm_to_vmem [thread:$0]  %s150_s6, 128, %s152_s30, %s134_s27, %s969_s7, %s969_s7, %s970_s8  }
  0x20 PF: > { %160 = sbr.rel (!%p1032_p4) target bundleno = 41 (0x29), region = 24  ;;  %s161_s15 = sand.u32 (%p1032_p4), 1, %s955_s11  }
  0x21   : > { %s753_s16 = sshll.u32 (%p1032_p4), %s161_s15, 6  ;;  %s162_s18 = scalar_lea.sflag (%p1032_p4), [#allocation6], %s161_s15 }
  0x22   : > { %s165_s20 = scalar_lea.vmem (%p1032_p4), [#allocation5], %s753_s16 }
  0x25   : > { %171 = vsyncadd %s162_s18, 896  ;;  %s754_s25 = sshll.u32 %s963_s13, 3  ;;  %s179_s26 = sshll.u32 %s165_s20, 4  ;;  %s180_s26 = int_to_ptr.vmem [resolvable:$true] %s179_s26 }
  0x26   : > { %s175_s3 = scalar_lea.hbm %s1213_s1, %s754_s25  ;;  %s971_s27 = smov 128  }
  0x27   : > { %s177_s4 = sshll.u32 %s175_s3, 4  ;;  %s972_s30 = smov 8   ;;  %s178_s4 = int_to_ptr.hbm [resolvable:$true] %s177_s4 }
  0x28   : > { %185 = dma.hbm_to_vmem [thread:$0]  %s178_s4, 128, %s180_s26, %s162_s18, %s971_s27, %s971_s27, %s972_s30  }
  0x29 PF: > { %p755_p13 = scmp.ge.s32.totalorder %s967_s14, 1  ;;  %p187_p0 = scmp.lt.s32.totalorder %s967_s14, 3 }
  0x2b   : > { %p188_p1 = pnand %p755_p13, %p187_p0 }
  0x2c   : > { %s1073_s19 = sand.u32 (!%p188_p1), 1, %s951_s10  }
  0x2d   : > { %191 = sbr.rel (%p188_p1) target bundleno = 101 (0x65), region = 28  ;;  %s756_s5 = sshll.u32 (!%p188_p1), %s1073_s19, 6 }
  0x2e   : > { %s194_s6 = scalar_lea.sflag (!%p188_p1), [#allocation3], %s1073_s19  ;;  %s197_s7 = scalar_lea.vmem (!%p188_p1), [#allocation2], %s756_s5 }
  0x32   : > { %934 = dma.done.wait (%p1038_p8), %s194_s6, 1024  }
  0x33   : > { %936 = vsyncadd (%p1038_p8), %s194_s6, 4294966272  ;;  %s204_s8 = scalar_lea.sflag [#allocation6], %s1073_s19  ;;  %s207_s15 = scalar_lea.vmem [#allocation5], %s756_s5 }
  0x34   : > { %938 = dma.done.wait (%p1038_p8), %s204_s8, 1024  }
  0x35   : > { %940 = vsyncadd (%p1038_p8), %s204_s8, 4294966272  ;;  %v420_v0 = vld [vmem:[%s197_s7] sm:$0xff]  ;;  %v1088_v2 = vld [vmem:[%s207_s15 + $0x8] sm:$0xff]  ;;  %v973_v10 = vmov 0.0   ;;  %s758_s21 = sshll.u32 %s1073_s19, 4  ;;  %s768_s16 = sshll.u32 %s959_s12, 4 }
  0x36   : > { %v1086_v1 = vld [vmem:[%s207_s15] sm:$0xff]  ;;  %v1090_v3 = vld [vmem:[%s207_s15 + $0x10] sm:$0xff]  ;;  %v1092_v4 = vld [vmem:[%s207_s15 + $0x18] sm:$0xff]  ;;  %vm489_vm1 = vcmp.ge.f32.partialorder %v1088_v2, 0.025  ;;  %vm513_vm9 = vcmp.ge.f32.partialorder %v1088_v2, 0.0625  ;;  %s635_s25 = scalar_lea.hbm %s1214_s2, %s768_s16 }
  0x37   : > { %v1094_v5 = vld [vmem:[%s207_s15 + $0x20] sm:$0xff]  ;;  %vm488_vm0 = vcmp.ge.f32.partialorder %v1086_v1, 0.025  ;;  %v1097_v6 = vld [vmem:[%s207_s15 + $0x28] sm:$0xff]  ;;  %v1099_v7 = vld [vmem:[%s207_s15 + $0x30] sm:$0xff]  ;;  %v438_v9 = vsub.f32 %v420_v0, %v1086_v1  ;;  %v497_v12 = vsel %vm489_vm1, 1.0, %v973_v10 }
  0x38   : > { %v1101_v8 = vld [vmem:[%s207_s15 + $0x38] sm:$0xff]  ;;  %vm490_vm2 = vcmp.ge.f32.partialorder %v1090_v3, 0.025  ;;  %vm491_vm3 = vcmp.ge.f32.partialorder %v1092_v4, 0.025  ;;  %v496_v11 = vsel %vm488_vm0, 1.0, %v973_v10 }
  0x39   : > { %vm492_vm4 = vcmp.ge.f32.partialorder %v1094_v5, 0.025  ;;  %vm493_vm5 = vcmp.ge.f32.partialorder %v1097_v6, 0.025  ;;  %vm494_vm6 = vcmp.ge.f32.partialorder %v1099_v7, 0.025 }
  0x3a   : > { %vm495_vm7 = vcmp.ge.f32.partialorder %v1101_v8, 0.025  ;;  %v498_v13 = vsel %vm490_vm2, 1.0, %v973_v10  ;;  %v499_v14 = vsel %vm491_vm3, 1.0, %v973_v10  ;;  %v1115_v15 = vand.u32 2147483647, %v438_v9 }
  0x3b   : > { %v500_v16 = vsel %vm492_vm4, 1.0, %v973_v10  ;;  %vm512_vm8 = vcmp.ge.f32.partialorder %v1086_v1, 0.0625  ;;  %v501_v17 = vsel %vm493_vm5, 1.0, %v973_v10  ;;  %v502_v18 = vsel %vm494_vm6, 1.0, %v973_v10  ;;  %s233_s26 = scalar_lea.vmem [#allocation7], %s758_s21  ;;  %s638_s29 = sshll.u32 %s635_s25, 4  ;;  %s639_s29 = int_to_ptr.hbm [resolvable:$true] %s638_s29 }
  0x3c   : > { %v503_v19 = vsel %vm495_vm7, 1.0, %v973_v10  ;;  %v504_v20 = vadd.f32 1.0, %v496_v11  ;;  %v505_v21 = vadd.f32 1.0, %v497_v12  ;;  %v506_v22 = vadd.f32 1.0, %v498_v13  ;;  %s636_s28 = sshll.u32 %s233_s26, 4  ;;  %s624_s12 = scalar_lea.sflag [#allocation4], %s1073_s19  ;;  %s637_s28 = int_to_ptr.vmem [resolvable:$true] %s636_s28 }
  0x3d   : > { %v507_v23 = vadd.f32 1.0, %v499_v14  ;;  %v508_v24 = vadd.f32 1.0, %v500_v16  ;;  %vm514_vm10 = vcmp.ge.f32.partialorder %v1090_v3, 0.0625  ;;  %vm515_vm11 = vcmp.ge.f32.partialorder %v1092_v4, 0.0625  ;;  %s895_s3 = sshra.s32 %s639_s29, 4  ;;  %s901_s5 = scalar_lea.hbm %s1214_s2, 32  ;;  %s896_s3 = int_to_ptr.hbm [resolvable:$true] %s895_s3 }
  0x3e   : > { %vm516_vm12 = vcmp.ge.f32.partialorder %v1094_v5, 0.0625  ;;  %vm517_vm13 = vcmp.ge.f32.partialorder %v1097_v6, 0.0625  ;;  %vm518_vm14 = vcmp.ge.f32.partialorder %v1099_v7, 0.0625  ;;  %vm519_vm15 = vcmp.ge.f32.partialorder %v1101_v8, 0.0625  ;;  %s897_s4 = scalar_lea.hbm %s896_s3, 16  ;;  %p902_p5 = scmp.lt.s32.totalorder %s896_s3, %s1214_s2 }
  0x3f   : > { %v520_v25 = vsel %vm512_vm8, 3.0, %v973_v10  ;;  %v521_v26 = vsel %vm513_vm9, 3.0, %v973_v10  ;;  %v522_v27 = vsel %vm514_vm10, 3.0, %v973_v10  ;;  %v523_v28 = vsel %vm515_vm11, 3.0, %v973_v10  ;;  %p898_p2 = scmp.ne.s32.totalorder %s896_s3, %s897_s4  ;;  %p903_p6 = scmp.lt.s32.totalorder %s901_s5, %s897_s4 }
  0x40   : > { %v524_v29 = vsel %vm516_vm12, 3.0, %v973_v10  ;;  %v509_v30 = vadd.f32 1.0, %v501_v17  ;;  %v510_v31 = vadd.f32 1.0, %v502_v18  ;;  %v511_v32 = vadd.f32 1.0, %v503_v19 }
  0x41   : > { %v525_v33 = vsel %vm517_vm13, 3.0, %v973_v10  ;;  %v526_v34 = vsel %vm518_vm14, 3.0, %v973_v10  ;;  %v527_v35 = vsel %vm519_vm15, 3.0, %v973_v10  ;;  %v528_v36 = vadd.f32 %v520_v25, %v504_v20  ;;  %p899_p3 = pnand %p898_p2, %p1042_p9  ;;  %p904_p7 = por %p903_p6, %p902_p5 }
  0x42   : > { %v529_v37 = vadd.f32 %v521_v26, %v505_v21  ;;  %v530_v38 = vadd.f32 %v522_v27, %v506_v22  ;;  %v531_v39 = vadd.f32 %v523_v28, %v507_v23  ;;  %v532_v40 = vadd.f32 %v524_v29, %v508_v24 }
  0x43   : > { %vm536_vm0 = vcmp.ge.f32.partialorder %v1086_v1, 0.125  ;;  %vm537_vm1 = vcmp.ge.f32.partialorder %v1088_v2, 0.125  ;;  %vm538_vm2 = vcmp.ge.f32.partialorder %v1090_v3, 0.125  ;;  %vm539_vm3 = vcmp.ge.f32.partialorder %v1092_v4, 0.125  ;;  %p900_p4 = pneg %p899_p3 }
  0x44   : > { %vm540_vm4 = vcmp.ge.f32.partialorder %v1094_v5, 0.125  ;;  %vm541_vm5 = vcmp.ge.f32.partialorder %v1097_v6, 0.125  ;;  %vm542_vm6 = vcmp.ge.f32.partialorder %v1099_v7, 0.125  ;;  %vm543_vm7 = vcmp.ge.f32.partialorder %v1101_v8, 0.125 }
  0x45   : > { %v544_v41 = vsel %vm536_vm0, 5.0, %v973_v10  ;;  %v545_v42 = vsel %vm537_vm1, 5.0, %v973_v10  ;;  %v546_v43 = vsel %vm538_vm2, 5.0, %v973_v10  ;;  %v547_v44 = vsel %vm539_vm3, 5.0, %v973_v10  ;;  %p905_p8 = pnand %p904_p7, %p900_p4 }
  0x46   : > { %v548_v45 = vsel %vm540_vm4, 5.0, %v973_v10  ;;  %v533_v46 = vadd.f32 %v525_v33, %v509_v30  ;;  %v534_v47 = vadd.f32 %v526_v34, %v510_v31  ;;  %v535_v48 = vadd.f32 %v527_v35, %v511_v32 }
  0x47   : > { %v549_v49 = vsel %vm541_vm5, 5.0, %v973_v10  ;;  %v550_v50 = vsel %vm542_vm6, 5.0, %v973_v10  ;;  %v551_v51 = vsel %vm543_vm7, 5.0, %v973_v10  ;;  %v552_v52 = vadd.f32 %v544_v41, %v528_v36 }
  0x48   : > { %v553_v53 = vadd.f32 %v545_v42, %v529_v37  ;;  %v554_v54 = vadd.f32 %v546_v43, %v530_v38  ;;  %v555_v55 = vadd.f32 %v547_v44, %v531_v39  ;;  %v556_v56 = vadd.f32 %v548_v45, %v532_v40 }
  0x49   : > { %vm560_vm8 = vcmp.ge.f32.partialorder %v1086_v1, 0.375  ;;  %vm561_vm9 = vcmp.ge.f32.partialorder %v1088_v2, 0.375  ;;  %vm562_vm10 = vcmp.ge.f32.partialorder %v1090_v3, 0.375  ;;  %vm563_vm11 = vcmp.ge.f32.partialorder %v1092_v4, 0.375 }
  0x4a   : > { %vm564_vm12 = vcmp.ge.f32.partialorder %v1094_v5, 0.375  ;;  %v557_v57 = vadd.f32 %v549_v49, %v533_v46  ;;  %vm565_vm13 = vcmp.ge.f32.partialorder %v1097_v6, 0.375  ;;  %vm566_vm14 = vcmp.ge.f32.partialorder %v1099_v7, 0.375 }
  0x4b   : > { %v568_v58 = vsel %vm560_vm8, 20.0, %v973_v10  ;;  %v569_v59 = vsel %vm561_vm9, 20.0, %v973_v10  ;;  %v570_v60 = vsel %vm562_vm10, 20.0, %v973_v10  ;;  %v571_v61 = vsel %vm563_vm11, 20.0, %v973_v10 }
  0x4c   : > { %v572_v62 = vsel %vm564_vm12, 20.0, %v973_v10  ;;  %v558_v63 = vadd.f32 %v550_v50, %v534_v47  ;;  %vm567_vm15 = vcmp.ge.f32.partialorder %v1101_v8, 0.375  ;;  %v573_v0 = vsel %vm565_vm13, 20.0, %v973_v10 }
  0x4d   : > { %v576_v1 = vadd.f32 %v568_v58, %v552_v52  ;;  %v577_v2 = vadd.f32 %v569_v59, %v553_v53  ;;  %v578_v3 = vadd.f32 %v570_v60, %v554_v54  ;;  %v579_v4 = vadd.f32 %v571_v61, %v555_v55 }
  0x4e   : > { %v580_v5 = vadd.f32 %v572_v62, %v556_v56  ;;  %v559_v6 = vadd.f32 %v551_v51, %v535_v48  ;;  %v574_v7 = vsel %vm566_vm14, 20.0, %v973_v10  ;;  %v581_v11 = vadd.f32 %v573_v0, %v557_v57 }
  0x4f   : > { %v584_v9 = vmul.f32 %v576_v1, %v1115_v15  ;;  %v585_v12 = vmul.f32 0.0, %v577_v2  ;;  %v586_v13 = vmul.f32 0.0, %v578_v3  ;;  %v587_v14 = vmul.f32 0.0, %v579_v4 }
  0x50   : > { %v575_v16 = vsel %vm567_vm15, 20.0, %v973_v10  ;;  %v582_v17 = vadd.f32 %v574_v7, %v558_v63  ;;  %v588_v18 = vmul.f32 0.0, %v580_v5  ;;  %v589_v23 = vmul.f32 0.0, %v581_v11 }
  0x51   : > { %v592_v8 = vmul.f32 %v584_v9, %v1115_v15  ;;  %v593_v19 = vmul.f32 0.0, %v585_v12  ;;  %v594_v20 = vmul.f32 0.0, %v586_v13  ;;  %v607_v21 = vadd.f32 %v585_v12, %v584_v9 }
  0x52   : > { %v583_v22 = vadd.f32 %v575_v16, %v559_v6  ;;  %v595_v24 = vmul.f32 0.0, %v587_v14  ;;  %v590_v27 = vmul.f32 0.0, %v582_v17  ;;  %v596_v28 = vmul.f32 0.0, %v588_v18 }
  0x53   : > { %v600_v25 = vadd.f32 %v593_v19, %v592_v8  ;;  %v608_v26 = vadd.f32 %v607_v21, %v586_v13  ;;  %v597_v31 = vmul.f32 0.0, %v589_v23 }
  0x54   : > { %v591_v10 = vmul.f32 0.0, %v583_v22  ;;  %v598_v33 = vmul.f32 0.0, %v590_v27 }
  0x55   : > { %v601_v29 = vadd.f32 %v600_v25, %v594_v20  ;;  %v609_v30 = vadd.f32 %v608_v26, %v587_v14 }
  0x56   : > { %v599_v36 = vmul.f32 0.0, %v591_v10 }
  0x57   : > { %v602_v32 = vadd.f32 %v601_v29, %v595_v24  ;;  %v610_v15 = vadd.f32 %v609_v30, %v588_v18 }
  0x59   : > { %v603_v34 = vadd.f32 %v602_v32, %v596_v28  ;;  %v611_v35 = vadd.f32 %v610_v15, %v589_v23 }
  0x5b   : > { %v604_v37 = vadd.f32 %v603_v34, %v597_v31  ;;  %v612_v38 = vadd.f32 %v611_v35, %v590_v27 }
  0x5d   : > { %v605_v39 = vadd.f32 %v604_v37, %v598_v33  ;;  %v613_v40 = vadd.f32 %v612_v38, %v591_v10 }
  0x5f   : > { %v606_v41 = vadd.f32 %v605_v39, %v599_v36  ;;  %762 = vst [vmem:[%s233_s26 + $0x8] sm:$0xff] %v613_v40 }
  0x61   : > { %618 = vst [vmem:[%s233_s26] sm:$0xff] %v606_v41 }
  0x62   : > { %908 = shalt.err (!%p905_p8)
}
  0x63   : > { %s974_s19 = smov 128   ;;  %s975_s8 = smov 8  }
  0x64   : > { %771 = dma.vmem_to_hbm [thread:$0]  (%p1042_p9), %s637_s28, 256, %s639_s29, %s624_s12, %s974_s19, %s974_s19, %s975_s8  }
  0x65 PF: > { %s653_s15 = sand.u32 1, %s947_s9   ;;  %p774_p10 = pnand %p750_p12, %p1049_p11 }
  0x66   : > { %s654_s21 = scalar_lea.sflag [#allocation4], %s653_s15 }
  0x67   : > { %p775_p13 = pneg %p774_p10 }
  0x69   : > { %942 = dma.done.wait (%p775_p13), %s654_s21, 256  }
  0x6a   : > { %944 = vsyncadd (%p775_p13), %s654_s21, 4294967040  ;;  %s21_s14 = sadd.s32 1, %s967_s14   ;;  %s1219_s9 = smov %s951_s10 }
  0x6b   : > { %p18_p0 = scmp.ge.s32.totalorder %s21_s14, 4   ;;  %s1220_s10 = smov %s955_s11 }
  0x6c   : > { %s1221_s11 = smov %s1047_s23  ;;  %s1222_s12 = smov %s963_s13 }
  0x6d   : > { %s1223_s13 = smov %s1225_s17  ;;  %20 = sbr.rel (!%p18_p0) target bundleno = 8 (0x8), region = 100 }
  0x72   :  { %660 = vsyncpa [#allocation3], 1 }
  0x73   :  { %662 = vsyncpa [#allocation3 + $0x1], 1 }
  0x74   :  { %663 = vsyncpa [#allocation6], 1 }
  0x75   :  { %665 = vsyncpa [#allocation6 + $0x1], 1 }
  0x76   :  { %666 = vsyncpa [#allocation4], 1 }
  0x77   :  { %668 = vsyncpa [#allocation4 + $0x1], 1 }

</bundles_post_ra>
